<compile_context>
chip_gen: v7x
topology: tpu7x:2x2x1
jax: 0.10.0
libtpu: 0.0.40
codegen_flags: <defaults>
</compile_context>

<pallas_src>
import functools

import jax
import jax.numpy as jnp
from jax.experimental import pallas as pl
from jax.experimental.pallas import tpu as pltpu


_VMEM_SPEC = pl.BlockSpec(memory_space=pltpu.MemorySpace.VMEM)


def _gat_fused_kernel(x_ref, mask_ref, *refs, heads, out_ch, num_layers):
    """Fused GAT forward: num_layers x (GATConv + ELU), then Linear."""
    out_ref = refs[-1]
    layer_refs = refs[:3 * num_layers]          # (w, a_mat, bias) per layer
    fc_w_ref = refs[3 * num_layers]
    fc_b_ref = refs[3 * num_layers + 1]

    mask_b = mask_ref[...]                      # (N, N) bf16, 0.0 / -1e30
    h = x_ref[...]                              # (N, Fin_pad) f32
    n = h.shape[0]

    for l in range(num_layers):                 # static unroll (tiny depth)
        w = layer_refs[3 * l][...]              # (Fin, H*C) bf16
        a_mat = layer_refs[3 * l + 1][...]      # (H*C, 128) bf16 block-diag att
        bias = layer_refs[3 * l + 2][...]       # (1, H*C) f32

        # Linear projection on the MXU (bf16 operands, f32 accumulation).
        xw = jnp.dot(h.astype(jnp.bfloat16), w,
                     preferred_element_type=jnp.float32)        # (N, H*C) f32
        xw_bf = xw.astype(jnp.bfloat16)

        # All per-head attention logits in one lane-dense MXU matmul:
        #   alpha[:, h] = a_src_h,  alpha[:, H + h] = a_dst_h,  rest zero-pad.
        alpha = jnp.dot(xw_bf, a_mat,
                        preferred_element_type=jnp.float32)     # (N, 128)
        a_src_t = jnp.transpose(alpha[:, :heads])               # (H, N)

        head_outs = []
        for hd in range(heads):                 # static unroll over heads
            # e[i, j] = a_dst_h[i] + a_src_h[j]
            e = alpha[:, heads + hd:heads + hd + 1] + a_src_t[hd:hd + 1, :]
            # leaky_relu(slope=0.2) == max(e, 0.2e) for slope < 1
            e = jnp.maximum(e, 0.2 * e)
            e = e + mask_b                      # bf16 bias promotes to f32
            e = e - jnp.max(e, axis=1, keepdims=True)
            p = jnp.exp(e)                      # masked entries -> exactly 0
            inv_l = pl.reciprocal(jnp.sum(p, axis=1, keepdims=True),
                                  approx=True)  # (N, 1), EUP slot

            # Each head only aggregates its own C output columns.
            agg = jnp.dot(p.astype(jnp.bfloat16),
                          xw_bf[:, hd * out_ch:(hd + 1) * out_ch],
                          preferred_element_type=jnp.float32)   # (N, C)
            head_outs.append(agg * inv_l)       # deferred softmax normalization

        out = jnp.concatenate(head_outs, axis=1) + bias         # (N, H*C)
        # F.elu (exp only on the clamped negative branch)
        h = jnp.where(out > 0.0, out,
                      jnp.exp(jnp.minimum(out, 0.0)) - 1.0)

    # Final nn.Linear (bf16 operands, f32 accumulation, lane-dense padded out).
    out_ref[...] = (jnp.dot(h.astype(jnp.bfloat16), fc_w_ref[...],
                            preferred_element_type=jnp.float32)
                    + fc_b_ref[...])


def _pad_last(a, target):
    pad = target - a.shape[-1]
    if pad <= 0:
        return a
    widths = [(0, 0)] * (a.ndim - 1) + [(0, pad)]
    return jnp.pad(a, widths)


def _round_up(v, m):
    return ((v + m - 1) // m) * m


def _vmem_limit_bytes(n, fin_pad, heads, out_ch, num_layers, out_pad):
    """Derive a scoped-VMEM budget from the actual shapes, capped by HW."""
    hc = heads * out_ch
    resident = n * fin_pad * 4 + n * n * 2 + n * out_pad * 4
    params, in_dim = 0, fin_pad
    for _ in range(num_layers):
        params += in_dim * hc * 2 + hc * 128 * 2 + hc * 4
        in_dim = hc
    params += hc * out_pad * 2 + out_pad * 4
    # live temporaries: e/p (N,N) f32 + xw/alpha/out buffers
    temps = 3 * n * n * 4 + 6 * n * max(hc, 128) * 4
    need = 2 * (resident + params + temps)      # 2x margin / double buffering
    try:
        phys = pltpu.get_tpu_info().vmem_capacity_bytes
    except Exception:
        phys = 64 * 1024 * 1024                 # conservative (v7x)
    cap = int(phys * 0.85)
    return int(max(16 * 1024 * 1024, min(need, cap)))


def gat_forward(x, adj, layer_params, fc_w, fc_b, *, heads, out_ch):
    """Fused forward: x (N, Fin), adj (N, N) dense adj[dst, src] incl. self-loops."""
    n, fin = x.shape
    num_layers = len(layer_params)
    hc = heads * out_ch

    fin_pad = _round_up(fin, 128)
    out_dim = fc_w.shape[1]
    out_pad = _round_up(out_dim, 128)

    # Lane-dense padded inputs (zeros are exact no-ops for the matmuls).
    x_p = _pad_last(x, fin_pad)

    # Additive attention mask in bf16 (built once; graph is layer-invariant).
    mask_bias = jnp.where(adj > 0.0, 0.0, -1e30).astype(jnp.bfloat16)

    flat_params = []
    for li, (w, a_s, a_d, b) in enumerate(layer_params):
        w_p = w
        if li == 0 and fin_pad != fin:
            w_p = jnp.pad(w, ((0, fin_pad - fin), (0, 0)))
        # Block-diagonal (H*C, 128) matrix so that xw @ A = [a_src | a_dst | 0].
        a_mat = jnp.zeros((hc, 128), jnp.float32)
        for hd in range(heads):
            a_mat = a_mat.at[hd * out_ch:(hd + 1) * out_ch, hd].set(a_s[hd])
            a_mat = a_mat.at[hd * out_ch:(hd + 1) * out_ch, heads + hd].set(a_d[hd])
        flat_params += [w_p.astype(jnp.bfloat16),
                        a_mat.astype(jnp.bfloat16),
                        b.astype(jnp.float32)]

    fc_w_p = _pad_last(fc_w, out_pad).astype(jnp.bfloat16)
    fc_b_p = _pad_last(fc_b, out_pad).astype(jnp.float32)

    kernel = functools.partial(_gat_fused_kernel, heads=heads,
                               out_ch=out_ch, num_layers=num_layers)
    n_inputs = 2 + 3 * num_layers + 2
    vmem_limit = _vmem_limit_bytes(n, fin_pad, heads, out_ch, num_layers, out_pad)

    res = pl.pallas_call(
        kernel,
        out_shape=jax.ShapeDtypeStruct((n, out_pad), jnp.float32),
        in_specs=[_VMEM_SPEC] * n_inputs,
        out_specs=_VMEM_SPEC,
        compiler_params=pltpu.CompilerParams(vmem_limit_bytes=vmem_limit),
    )(x_p, mask_bias, *flat_params, fc_w_p, fc_b_p)
    return res[:, :out_dim]


def _glorot(key, shape):
    fan_in, fan_out = shape[0], shape[-1]
    limit = (6.0 / (fan_in + fan_out)) ** 0.5
    return jax.random.uniform(key, shape, jnp.float32, -limit, limit)


if __name__ == "__main__":
    N = 16           # num_nodes
    IN_CH = 8        # in_channels
    OUT_CH = 8       # out_channels
    HEADS = 2        # num_heads
    NUM_LAYERS = 2   # num_layers
    NUM_EDGES = 40

    root = jax.random.PRNGKey(0)
    k_x, k_src, k_dst, k_params = jax.random.split(root, 4)

    # Node features (num_nodes, in_channels)
    x = jax.random.normal(k_x, (N, IN_CH), dtype=jnp.float32)

    # edge_index (2, num_edges): row 0 = source, row 1 = target
    src = jax.random.randint(k_src, (NUM_EDGES,), 0, N)
    dst = jax.random.randint(k_dst, (NUM_EDGES,), 0, N)
    edge_index = jnp.stack([src, dst], axis=0)

    # Dense adjacency adj[dst, src], with self-loops (PyG default).
    adj = jnp.zeros((N, N), jnp.float32).at[edge_index[1], edge_index[0]].set(1.0)
    adj = jnp.maximum(adj, jnp.eye(N, dtype=jnp.float32))

    # Deterministic parameter init (shapes follow GATConv / nn.Linear).
    layer_params = []
    in_dim = IN_CH
    pkeys = jax.random.split(k_params, NUM_LAYERS * 3 + 2)
    ki = 0
    for _ in range(NUM_LAYERS):
        w = _glorot(pkeys[ki], (in_dim, HEADS * OUT_CH)); ki += 1
        a_s = _glorot(pkeys[ki], (HEADS, OUT_CH)); ki += 1
        a_d = _glorot(pkeys[ki], (HEADS, OUT_CH)); ki += 1
        b = jnp.zeros((1, HEADS * OUT_CH), jnp.float32)
        layer_params.append((w, a_s, a_d, b))
        in_dim = HEADS * OUT_CH

    fc_w = _glorot(pkeys[ki], (HEADS * OUT_CH, OUT_CH)); ki += 1
    fc_b = 0.01 * jax.random.normal(pkeys[ki], (1, OUT_CH), dtype=jnp.float32)

    out = gat_forward(x, adj, layer_params, fc_w, fc_b,
                      heads=HEADS, out_ch=OUT_CH)
    jax.block_until_ready(out)
    assert out.shape == (N, OUT_CH) and out.dtype == jnp.float32
    print("KERNEL_OK")
</pallas_src>

<mosaic_0001>
module attributes {stable_mosaic.version = 11 : i64} {
  func.func @_gat_fused_kernel(%arg0: memref<16x128xf32, #tpu.memory_space<vmem>>, %arg1: memref<16x16xbf16, #tpu.memory_space<vmem>>, %arg2: memref<128x16xbf16, #tpu.memory_space<vmem>>, %arg3: memref<16x128xbf16, #tpu.memory_space<vmem>>, %arg4: memref<1x16xf32, #tpu.memory_space<vmem>>, %arg5: memref<16x16xbf16, #tpu.memory_space<vmem>>, %arg6: memref<16x128xbf16, #tpu.memory_space<vmem>>, %arg7: memref<1x16xf32, #tpu.memory_space<vmem>>, %arg8: memref<16x128xbf16, #tpu.memory_space<vmem>>, %arg9: memref<1x128xf32, #tpu.memory_space<vmem>>, %arg10: memref<16x128xf32, #tpu.memory_space<vmem>>) attributes {dimension_semantics = [], scalar_prefetch = 0 : i64, scratch_operands = 0 : i64, tpu.core_type = #tpu.core_type<tc>} {
    %c0 = arith.constant 0 : index
    %c0_0 = arith.constant 0 : index
    %0 = vector.load %arg1[%c0, %c0_0] : memref<16x16xbf16, #tpu.memory_space<vmem>>, vector<16x16xbf16>
    %c0_1 = arith.constant 0 : index
    %c0_2 = arith.constant 0 : index
    %1 = vector.load %arg0[%c0_1, %c0_2] : memref<16x128xf32, #tpu.memory_space<vmem>>, vector<16x128xf32>
    %c0_3 = arith.constant 0 : index
    %c0_4 = arith.constant 0 : index
    %2 = vector.load %arg2[%c0_3, %c0_4] : memref<128x16xbf16, #tpu.memory_space<vmem>>, vector<128x16xbf16>
    %c0_5 = arith.constant 0 : index
    %c0_6 = arith.constant 0 : index
    %3 = vector.load %arg3[%c0_5, %c0_6] : memref<16x128xbf16, #tpu.memory_space<vmem>>, vector<16x128xbf16>
    %c0_7 = arith.constant 0 : index
    %c0_8 = arith.constant 0 : index
    %4 = vector.load %arg4[%c0_7, %c0_8] : memref<1x16xf32, #tpu.memory_space<vmem>>, vector<1x16xf32>
    %5 = arith.truncf %1 : vector<16x128xf32> to vector<16x128xbf16>
    %cst = arith.constant dense<0.000000e+00> : vector<16x16xf32>
    %6 = tpu.matmul %5, %2, %cst {dimension_numbers = #tpu.dot_dimension_numbers<[1], [0], [0], [1], [0, 0, 1, 1], [], []>} : vector<16x128xbf16>, vector<128x16xbf16>, vector<16x16xf32> -> vector<16x16xf32>
    %7 = arith.truncf %6 : vector<16x16xf32> to vector<16x16xbf16>
    %cst_9 = arith.constant dense<0.000000e+00> : vector<16x128xf32>
    %8 = tpu.matmul %7, %3, %cst_9 {dimension_numbers = #tpu.dot_dimension_numbers<[1], [0], [0], [1], [0, 0, 1, 1], [], []>} : vector<16x16xbf16>, vector<16x128xbf16>, vector<16x128xf32> -> vector<16x128xf32>
    %9 = vector.extract_strided_slice %8 {offsets = [0, 0], sizes = [16, 2], strides = [1, 1]} : vector<16x128xf32> to vector<16x2xf32>
    %10 = tpu.transpose %9, [1, 0] : vector<16x2xf32> -> vector<2x16xf32>
    %11 = vector.extract_strided_slice %8 {offsets = [0, 2], sizes = [16, 1], strides = [1, 1]} : vector<16x128xf32> to vector<16x1xf32>
    %12 = vector.extract_strided_slice %10 {offsets = [0, 0], sizes = [1, 16], strides = [1, 1]} : vector<2x16xf32> to vector<1x16xf32>
    %13 = vector.broadcast %11 : vector<16x1xf32> to vector<16x16xf32>
    %14 = vector.broadcast %12 : vector<1x16xf32> to vector<16x16xf32>
    %15 = arith.addf %13, %14 : vector<16x16xf32>
    %cst_10 = arith.constant 2.000000e-01 : f32
    %16 = vector.broadcast %cst_10 : f32 to vector<16x16xf32>
    %17 = arith.mulf %16, %15 : vector<16x16xf32>
    %18 = arith.maximumf %15, %17 : vector<16x16xf32>
    %19 = arith.extf %0 : vector<16x16xbf16> to vector<16x16xf32>
    %20 = arith.addf %18, %19 : vector<16x16xf32>
    %cst_11 = arith.constant dense<0xFF800000> : vector<16xf32>
    %21 = vector.multi_reduction <maximumf>, %20, %cst_11 [1] : vector<16x16xf32> to vector<16xf32>
    %22 = vector.shape_cast %21 : vector<16xf32> to vector<16x1xf32>
    %23 = vector.broadcast %22 : vector<16x1xf32> to vector<16x16xf32>
    %24 = arith.subf %20, %23 : vector<16x16xf32>
    %25 = math.exp %24 : vector<16x16xf32>
    %cst_12 = arith.constant dense<0.000000e+00> : vector<16xf32>
    %26 = vector.multi_reduction <add>, %25, %cst_12 [1] : vector<16x16xf32> to vector<16xf32>
    %27 = vector.shape_cast %26 : vector<16xf32> to vector<16x1xf32>
    %28 = tpu.reciprocal %27 {approx = true} : vector<16x1xf32> -> vector<16x1xf32>
    %29 = arith.truncf %25 : vector<16x16xf32> to vector<16x16xbf16>
    %30 = vector.extract_strided_slice %7 {offsets = [0, 0], sizes = [16, 8], strides = [1, 1]} : vector<16x16xbf16> to vector<16x8xbf16>
    %cst_13 = arith.constant dense<0.000000e+00> : vector<16x8xf32>
    %31 = tpu.matmul %29, %30, %cst_13 {dimension_numbers = #tpu.dot_dimension_numbers<[1], [0], [0], [1], [0, 0, 1, 1], [], []>} : vector<16x16xbf16>, vector<16x8xbf16>, vector<16x8xf32> -> vector<16x8xf32>
    %32 = vector.broadcast %28 : vector<16x1xf32> to vector<16x8xf32>
    %33 = arith.mulf %31, %32 : vector<16x8xf32>
    %34 = vector.extract_strided_slice %8 {offsets = [0, 3], sizes = [16, 1], strides = [1, 1]} : vector<16x128xf32> to vector<16x1xf32>
    %35 = vector.extract_strided_slice %10 {offsets = [1, 0], sizes = [1, 16], strides = [1, 1]} : vector<2x16xf32> to vector<1x16xf32>
    %36 = vector.broadcast %34 : vector<16x1xf32> to vector<16x16xf32>
    %37 = vector.broadcast %35 : vector<1x16xf32> to vector<16x16xf32>
    %38 = arith.addf %36, %37 : vector<16x16xf32>
    %cst_14 = arith.constant 2.000000e-01 : f32
    %39 = vector.broadcast %cst_14 : f32 to vector<16x16xf32>
    %40 = arith.mulf %39, %38 : vector<16x16xf32>
    %41 = arith.maximumf %38, %40 : vector<16x16xf32>
    %42 = arith.extf %0 : vector<16x16xbf16> to vector<16x16xf32>
    %43 = arith.addf %41, %42 : vector<16x16xf32>
    %cst_15 = arith.constant dense<0xFF800000> : vector<16xf32>
    %44 = vector.multi_reduction <maximumf>, %43, %cst_15 [1] : vector<16x16xf32> to vector<16xf32>
    %45 = vector.shape_cast %44 : vector<16xf32> to vector<16x1xf32>
    %46 = vector.broadcast %45 : vector<16x1xf32> to vector<16x16xf32>
    %47 = arith.subf %43, %46 : vector<16x16xf32>
    %48 = math.exp %47 : vector<16x16xf32>
    %cst_16 = arith.constant dense<0.000000e+00> : vector<16xf32>
    %49 = vector.multi_reduction <add>, %48, %cst_16 [1] : vector<16x16xf32> to vector<16xf32>
    %50 = vector.shape_cast %49 : vector<16xf32> to vector<16x1xf32>
    %51 = tpu.reciprocal %50 {approx = true} : vector<16x1xf32> -> vector<16x1xf32>
    %52 = arith.truncf %48 : vector<16x16xf32> to vector<16x16xbf16>
    %53 = vector.extract_strided_slice %7 {offsets = [0, 8], sizes = [16, 8], strides = [1, 1]} : vector<16x16xbf16> to vector<16x8xbf16>
    %cst_17 = arith.constant dense<0.000000e+00> : vector<16x8xf32>
    %54 = tpu.matmul %52, %53, %cst_17 {dimension_numbers = #tpu.dot_dimension_numbers<[1], [0], [0], [1], [0, 0, 1, 1], [], []>} : vector<16x16xbf16>, vector<16x8xbf16>, vector<16x8xf32> -> vector<16x8xf32>
    %55 = vector.broadcast %51 : vector<16x1xf32> to vector<16x8xf32>
    %56 = arith.mulf %54, %55 : vector<16x8xf32>
    %57 = tpu.concatenate %33, %56 in 1 : vector<16x8xf32>, vector<16x8xf32> -> vector<16x16xf32>
    %58 = vector.broadcast %4 : vector<1x16xf32> to vector<16x16xf32>
    %59 = arith.addf %57, %58 : vector<16x16xf32>
    %cst_18 = arith.constant 0.000000e+00 : f32
    %60 = vector.broadcast %cst_18 : f32 to vector<16x16xf32>
    %61 = arith.cmpf ogt, %59, %60 : vector<16x16xf32>
    %cst_19 = arith.constant 0.000000e+00 : f32
    %62 = vector.broadcast %cst_19 : f32 to vector<16x16xf32>
    %63 = arith.minimumf %59, %62 : vector<16x16xf32>
    %64 = math.exp %63 : vector<16x16xf32>
    %cst_20 = arith.constant 1.000000e+00 : f32
    %65 = vector.broadcast %cst_20 : f32 to vector<16x16xf32>
    %66 = arith.subf %64, %65 : vector<16x16xf32>
    %67 = arith.select %61, %59, %66 : vector<16x16xi1>, vector<16x16xf32>
    %c0_21 = arith.constant 0 : index
    %c0_22 = arith.constant 0 : index
    %68 = vector.load %arg5[%c0_21, %c0_22] : memref<16x16xbf16, #tpu.memory_space<vmem>>, vector<16x16xbf16>
    %c0_23 = arith.constant 0 : index
    %c0_24 = arith.constant 0 : index
    %69 = vector.load %arg6[%c0_23, %c0_24] : memref<16x128xbf16, #tpu.memory_space<vmem>>, vector<16x128xbf16>
    %c0_25 = arith.constant 0 : index
    %c0_26 = arith.constant 0 : index
    %70 = vector.load %arg7[%c0_25, %c0_26] : memref<1x16xf32, #tpu.memory_space<vmem>>, vector<1x16xf32>
    %71 = arith.truncf %67 : vector<16x16xf32> to vector<16x16xbf16>
    %cst_27 = arith.constant dense<0.000000e+00> : vector<16x16xf32>
    %72 = tpu.matmul %71, %68, %cst_27 {dimension_numbers = #tpu.dot_dimension_numbers<[1], [0], [0], [1], [0, 0, 1, 1], [], []>} : vector<16x16xbf16>, vector<16x16xbf16>, vector<16x16xf32> -> vector<16x16xf32>
    %73 = arith.truncf %72 : vector<16x16xf32> to vector<16x16xbf16>
    %cst_28 = arith.constant dense<0.000000e+00> : vector<16x128xf32>
    %74 = tpu.matmul %73, %69, %cst_28 {dimension_numbers = #tpu.dot_dimension_numbers<[1], [0], [0], [1], [0, 0, 1, 1], [], []>} : vector<16x16xbf16>, vector<16x128xbf16>, vector<16x128xf32> -> vector<16x128xf32>
    %75 = vector.extract_strided_slice %74 {offsets = [0, 0], sizes = [16, 2], strides = [1, 1]} : vector<16x128xf32> to vector<16x2xf32>
    %76 = tpu.transpose %75, [1, 0] : vector<16x2xf32> -> vector<2x16xf32>
    %77 = vector.extract_strided_slice %74 {offsets = [0, 2], sizes = [16, 1], strides = [1, 1]} : vector<16x128xf32> to vector<16x1xf32>
    %78 = vector.extract_strided_slice %76 {offsets = [0, 0], sizes = [1, 16], strides = [1, 1]} : vector<2x16xf32> to vector<1x16xf32>
    %79 = vector.broadcast %77 : vector<16x1xf32> to vector<16x16xf32>
    %80 = vector.broadcast %78 : vector<1x16xf32> to vector<16x16xf32>
    %81 = arith.addf %79, %80 : vector<16x16xf32>
    %cst_29 = arith.constant 2.000000e-01 : f32
    %82 = vector.broadcast %cst_29 : f32 to vector<16x16xf32>
    %83 = arith.mulf %82, %81 : vector<16x16xf32>
    %84 = arith.maximumf %81, %83 : vector<16x16xf32>
    %85 = arith.extf %0 : vector<16x16xbf16> to vector<16x16xf32>
    %86 = arith.addf %84, %85 : vector<16x16xf32>
    %cst_30 = arith.constant dense<0xFF800000> : vector<16xf32>
    %87 = vector.multi_reduction <maximumf>, %86, %cst_30 [1] : vector<16x16xf32> to vector<16xf32>
    %88 = vector.shape_cast %87 : vector<16xf32> to vector<16x1xf32>
    %89 = vector.broadcast %88 : vector<16x1xf32> to vector<16x16xf32>
    %90 = arith.subf %86, %89 : vector<16x16xf32>
    %91 = math.exp %90 : vector<16x16xf32>
    %cst_31 = arith.constant dense<0.000000e+00> : vector<16xf32>
    %92 = vector.multi_reduction <add>, %91, %cst_31 [1] : vector<16x16xf32> to vector<16xf32>
    %93 = vector.shape_cast %92 : vector<16xf32> to vector<16x1xf32>
    %94 = tpu.reciprocal %93 {approx = true} : vector<16x1xf32> -> vector<16x1xf32>
    %95 = arith.truncf %91 : vector<16x16xf32> to vector<16x16xbf16>
    %96 = vector.extract_strided_slice %73 {offsets = [0, 0], sizes = [16, 8], strides = [1, 1]} : vector<16x16xbf16> to vector<16x8xbf16>
    %cst_32 = arith.constant dense<0.000000e+00> : vector<16x8xf32>
    %97 = tpu.matmul %95, %96, %cst_32 {dimension_numbers = #tpu.dot_dimension_numbers<[1], [0], [0], [1], [0, 0, 1, 1], [], []>} : vector<16x16xbf16>, vector<16x8xbf16>, vector<16x8xf32> -> vector<16x8xf32>
    %98 = vector.broadcast %94 : vector<16x1xf32> to vector<16x8xf32>
    %99 = arith.mulf %97, %98 : vector<16x8xf32>
    %100 = vector.extract_strided_slice %74 {offsets = [0, 3], sizes = [16, 1], strides = [1, 1]} : vector<16x128xf32> to vector<16x1xf32>
    %101 = vector.extract_strided_slice %76 {offsets = [1, 0], sizes = [1, 16], strides = [1, 1]} : vector<2x16xf32> to vector<1x16xf32>
    %102 = vector.broadcast %100 : vector<16x1xf32> to vector<16x16xf32>
    %103 = vector.broadcast %101 : vector<1x16xf32> to vector<16x16xf32>
    %104 = arith.addf %102, %103 : vector<16x16xf32>
    %cst_33 = arith.constant 2.000000e-01 : f32
    %105 = vector.broadcast %cst_33 : f32 to vector<16x16xf32>
    %106 = arith.mulf %105, %104 : vector<16x16xf32>
    %107 = arith.maximumf %104, %106 : vector<16x16xf32>
    %108 = arith.extf %0 : vector<16x16xbf16> to vector<16x16xf32>
    %109 = arith.addf %107, %108 : vector<16x16xf32>
    %cst_34 = arith.constant dense<0xFF800000> : vector<16xf32>
    %110 = vector.multi_reduction <maximumf>, %109, %cst_34 [1] : vector<16x16xf32> to vector<16xf32>
    %111 = vector.shape_cast %110 : vector<16xf32> to vector<16x1xf32>
    %112 = vector.broadcast %111 : vector<16x1xf32> to vector<16x16xf32>
    %113 = arith.subf %109, %112 : vector<16x16xf32>
    %114 = math.exp %113 : vector<16x16xf32>
    %cst_35 = arith.constant dense<0.000000e+00> : vector<16xf32>
    %115 = vector.multi_reduction <add>, %114, %cst_35 [1] : vector<16x16xf32> to vector<16xf32>
    %116 = vector.shape_cast %115 : vector<16xf32> to vector<16x1xf32>
    %117 = tpu.reciprocal %116 {approx = true} : vector<16x1xf32> -> vector<16x1xf32>
    %118 = arith.truncf %114 : vector<16x16xf32> to vector<16x16xbf16>
    %119 = vector.extract_strided_slice %73 {offsets = [0, 8], sizes = [16, 8], strides = [1, 1]} : vector<16x16xbf16> to vector<16x8xbf16>
    %cst_36 = arith.constant dense<0.000000e+00> : vector<16x8xf32>
    %120 = tpu.matmul %118, %119, %cst_36 {dimension_numbers = #tpu.dot_dimension_numbers<[1], [0], [0], [1], [0, 0, 1, 1], [], []>} : vector<16x16xbf16>, vector<16x8xbf16>, vector<16x8xf32> -> vector<16x8xf32>
    %121 = vector.broadcast %117 : vector<16x1xf32> to vector<16x8xf32>
    %122 = arith.mulf %120, %121 : vector<16x8xf32>
    %123 = tpu.concatenate %99, %122 in 1 : vector<16x8xf32>, vector<16x8xf32> -> vector<16x16xf32>
    %124 = vector.broadcast %70 : vector<1x16xf32> to vector<16x16xf32>
    %125 = arith.addf %123, %124 : vector<16x16xf32>
    %cst_37 = arith.constant 0.000000e+00 : f32
    %126 = vector.broadcast %cst_37 : f32 to vector<16x16xf32>
    %127 = arith.cmpf ogt, %125, %126 : vector<16x16xf32>
    %cst_38 = arith.constant 0.000000e+00 : f32
    %128 = vector.broadcast %cst_38 : f32 to vector<16x16xf32>
    %129 = arith.minimumf %125, %128 : vector<16x16xf32>
    %130 = math.exp %129 : vector<16x16xf32>
    %cst_39 = arith.constant 1.000000e+00 : f32
    %131 = vector.broadcast %cst_39 : f32 to vector<16x16xf32>
    %132 = arith.subf %130, %131 : vector<16x16xf32>
    %133 = arith.select %127, %125, %132 : vector<16x16xi1>, vector<16x16xf32>
    %134 = arith.truncf %133 : vector<16x16xf32> to vector<16x16xbf16>
    %c0_40 = arith.constant 0 : index
    %c0_41 = arith.constant 0 : index
    %135 = vector.load %arg8[%c0_40, %c0_41] : memref<16x128xbf16, #tpu.memory_space<vmem>>, vector<16x128xbf16>
    %cst_42 = arith.constant dense<0.000000e+00> : vector<16x128xf32>
    %136 = tpu.matmul %134, %135, %cst_42 {dimension_numbers = #tpu.dot_dimension_numbers<[1], [0], [0], [1], [0, 0, 1, 1], [], []>} : vector<16x16xbf16>, vector<16x128xbf16>, vector<16x128xf32> -> vector<16x128xf32>
    %c0_43 = arith.constant 0 : index
    %c0_44 = arith.constant 0 : index
    %137 = vector.load %arg9[%c0_43, %c0_44] : memref<1x128xf32, #tpu.memory_space<vmem>>, vector<1x128xf32>
    %138 = vector.broadcast %137 : vector<1x128xf32> to vector<16x128xf32>
    %139 = arith.addf %136, %138 : vector<16x128xf32>
    %c0_45 = arith.constant 0 : index
    %c0_46 = arith.constant 0 : index
    %140 = vector.load %arg10[%c0_45, %c0_46] : memref<16x128xf32, #tpu.memory_space<vmem>>, vector<16x128xf32>
    tpu.vector_store %arg10[%c0_45, %c0_46], %139 {strides = array<i32>} : memref<16x128xf32, #tpu.memory_space<vmem>>, vector<16x128xf32>,
    return
  }
}

</mosaic_0001>

<bundles_post_ra>
// kernel: tpu_custom_call.1
= control target key start
LH: loop header
LB: loop body
LE: loop exit
PB: predicated region body
PF: predicated region fallthrough
CT: control target
= control target key end

     0   :  { %v1087_v1 = vmov 0.0   ;;  %vm1088_vm0 = vmmov 0   ;;  %s1314_s0 = inlined_call_operand.vmem [shape: f32[16,128], index: 0, kind: input, shape index: {}]   ;;  %s1315_s1 = inlined_call_operand.vmem [shape: bf16[16,16], index: 1, kind: input, shape index: {}]   ;;  %s1316_s2 = inlined_call_operand.vmem [shape: bf16[128,16], index: 2, kind: input, shape index: {}]   ;;  %s1317_s3 = inlined_call_operand.vmem [shape: bf16[16,128], index: 3, kind: input, shape index: {}]   ;;  %s1318_s4 = inlined_call_operand.vmem [shape: f32[1,16], index: 4, kind: input, shape index: {}]   ;;  %s1319_s5 = inlined_call_operand.vmem [shape: bf16[16,16], index: 5, kind: input, shape index: {}]   ;;  %s1320_s6 = inlined_call_operand.vmem [shape: bf16[16,128], index: 6, kind: input, shape index: {}]   ;;  %s1321_s7 = inlined_call_operand.vmem [shape: f32[1,16], index: 7, kind: input, shape index: {}]   ;;  %s1322_s8 = inlined_call_operand.vmem [shape: bf16[16,128], index: 8, kind: input, shape index: {}]   ;;  %s1323_s9 = inlined_call_operand.vmem [shape: f32[1,128], index: 9, kind: input, shape index: {}]   ;;  %s1324_s10 = inlined_call_operand.hbm [shape: f32[16,128], index: 10, kind: output, shape index: {}]  }
   0x1   :  { %v1011_v0 = vld [vmem:[%s1316_s2] sm:$0xff]   ;;  %930 = vmatprep.subr.bf16.mxu0 %v1087_v1  ;;  %950 = vmatprep.subr.bf16.mxu1 %v1087_v1  ;;  %v1012_v2 = vld [vmem:[%s1316_s2 + $0x8] sm:$0xff]   ;;  %v1013_v3 = vld [vmem:[%s1316_s2 + $0x10] sm:$0xff]  }
   0x2   :  { %931 = vmatpush3.bf16.msra.mxu0 %v1011_v0  ;;  %946 = vmatprep.mubr.msk.bf16.mxu0 %vm1088_vm0, %v1087_v1  ;;  %v1014_v4 = vld [vmem:[%s1316_s2 + $0x18] sm:$0xff]  }
   0x3   :  { %932 = vmatprep.subr.bf16.mxu0 %v1087_v1  ;;  %952 = vmatprep.mubr.msk.bf16.mxu1 %vm1088_vm0, %v1087_v1 }
   0x6   :  { %933 = vmatpush3.bf16.msra.mxu0 %v1012_v2 }
   0x7   :  { %934 = vmatprep.subr.bf16.mxu0 %v1087_v1 }
   0xa   :  { %935 = vmatpush3.bf16.msra.mxu0 %v1013_v3 }
   0xb   :  { %936 = vmatprep.subr.bf16.mxu0 %v1087_v1 }
   0xc   :  { %15 = vsyncpa [#allocation3], 0  ;;  %v1015_v5 = vld [vmem:[%s1316_s2 + $0x20] sm:$0xff]   ;;  %v1016_v6 = vld [vmem:[%s1316_s2 + $0x28] sm:$0xff]   ;;  %v1089_v13 = vmov 3   ;;  %v1090_v14 = vmov 2   ;;  %v244_v24 = vlaneseq }
   0xd   :  { %v1017_v7 = vld [vmem:[%s1316_s2 + $0x30] sm:$0xff]   ;;  %v1018_v8 = vld [vmem:[%s1316_s2 + $0x38] sm:$0xff]   ;;  %v39_v9 = vld [vmem:[%s1314_s0] sm:$0xff]  ;;  %1007 = vset.pattern.permute.xlu1 %v1089_v13  ;;  %1006 = vset.pattern.permute.xlu0 %v1090_v14  ;;  %vm157_vm1 = vcmask 130048   ;;  %s1092_s14 = smov 8   ;;  %vm424_vm2 = vcmask 64512  }
   0xe   :  { %937 = vmatpush3.bf16.msra.mxu0 %v1014_v4  ;;  %v40_v10 = vld [vmem:[%s1314_s0 + $0x8] sm:$0xff]  ;;  %v1019_v12 = vld [vmem:[%s1317_s3] sm:$0xff]   ;;  %v1207_v26 = vshrl.u32 %v244_v24, 7  ;;  %s1093_s22 = smov [#allocation2]  }
   0xf   :  { %938 = vmatprep.subr.bf16.mxu0 %v1087_v1  ;;  %v60_v11 = vpack.c.bf16 %v40_v10, %v39_v9  ;;  %951 = vmatpush3.bf16.msra.mxu1 %v1019_v12  ;;  %v902_v34 = vld [vmem:[%s1315_s1] sm:$0xff]   ;;  %s1091_s1 = smov 120   ;;  %s863_s23 = sshll.u32 %s1093_s22, 4  ;;  %s864_s23 = int_to_ptr.vmem [resolvable:$true] %s863_s23 }
  0x10   :  { %956 = vmatprep.subr.bf16.mxu1 %v1087_v1  ;;  %v246_v29 = vsub.s32 0, %v1207_v26  ;;  %v335_v30 = vsub.s32 1, %v1207_v26  ;;  %v1218_v40 = vunpack.c.h.bf16 %v902_v34  ;;  %v1220_v44 = vunpack.c.l.bf16 %v902_v34  ;;  %s1063_s24 = scalar_lea.vmem %s864_s23, 256  ;;  %p1068_p1 = scmp.lt.s32.totalorder %s864_s23, %s864_s23 }
  0x11   :  { %p1064_p0 = scmp.ne.s32.totalorder %s864_s23, %s1063_s24  ;;  %p1069_p2 = scmp.lt.s32.totalorder %s1063_s24, %s1063_s24 }
  0x12   :  { %939 = vmatpush3.bf16.msra.mxu0 %v1015_v5 }
  0x13   :  { %940 = vmatprep.subr.bf16.mxu0 %v1087_v1  ;;  %p1070_p3 = por %p1069_p2, %p1068_p1 }
  0x15   :  { %p1071_p4 = pnand %p1070_p3, %p1064_p0 }
  0x16   :  { %941 = vmatpush3.bf16.msra.mxu0 %v1016_v6 }
  0x17   :  { %942 = vmatprep.subr.bf16.mxu0 %v1087_v1 }
  0x1a   :  { %943 = vmatpush3.bf16.msra.mxu0 %v1017_v7 }
  0x1b   :  { %944 = vmatprep.subr.bf16.mxu0 %v1087_v1 }
  0x1e   :  { %945 = vmatpush3.bf16.msra.mxu0 %v1018_v8 }
  0x1f   :  { %980 = vmatprep.subr.bf16.mxu0 %v1087_v1 }
  0x21   :  { %947 = vmatmul.mubr.bf16.vlgmr.msra.gmra.mrb[0].mxu0 %v60_v11 }
  0x22   :  { %982 = vmatprep.mubr.msk.bf16.mxu0 %vm1088_vm0, %v1087_v1 }
  0xf4   :  { %v143_v15 = vpop.f32.mrb[0].mxu0 }
  0xf5   :  { %v948_v16 = vpop.f32.mrb[1].mxu0 }
  0xf6   :  { %v146_v17 = vpop.f32.mrb[2].mxu0 }
  0xf7   :  { %v150_v18 = vpack.c.bf16 %v146_v17, %v143_v15  ;;  %v949_v19 = vpop.f32.mrb[3].mxu0 }
  0xf9   :  { %953 = vmatmul.mubr.msk.bf16.vlgmr.msra.gmra.mrb[0].mxu1 %vm157_vm1, %v150_v18 }
  0xfa   :  { %957 = vmatpush3.bf16.msra.mxu1 %v150_v18  ;;  %958 = vmatprep.mubr.msk.bf16.mxu1 %vm1088_vm0, %v1087_v1 }
  0xfb   :  { %962 = vmatprep.subr.bf16.mxu1 %v1087_v1 }
 0x1cc   :  { %v195_v20 = vpop.f32.mrb[0].mxu1 }
 0x1cd   :  { %326 = vperm.xlu1 %1007, %v195_v20   ;;  %236 = vperm.xlu0 %1006, %v195_v20   ;;  %v954_v21 = vpop.f32.mrb[1].mxu1 }
 0x1ce   :  { %v198_v22 = vpop.f32.mrb[2].mxu1 }
 0x1cf   :  { %v955_v23 = vpop.f32.mrb[3].mxu1 }
 0x1d1   :  { %330 = vperm.xlu1 %1007, %v198_v22   ;;  %241 = vperm.xlu0 %1006, %v198_v22  }
 0x1ef   :  { %202 = vxpose.xlu0.b32.start [1/2] (short) (narrow) %v195_v20, 8 }
 0x1f3   :  { %203 = vxpose.xlu0.b32.end [2/2] (short) (narrow) %v198_v22, 8 }
 0x21c   :  { %1008 = vset.pattern.permute.xlu0 %v1089_v13 }
 0x24c   :  { %v237_v25 = vpop.permute.xlu0 %236  ;;  %v327_v27 = vpop.permute.xlu1 %326 }
 0x250   :  { %v242_v28 = vpop.permute.xlu0 %241  ;;  %v331_v35 = vpop.permute.xlu1 %330 }
 0x26f   :  { %v218_v31 = vpop.trf.xlu0 }
 0x270   :  { %v247_v32 = vrot.slane %v218_v31, %v246_v29  ;;  %v336_v33 = vrot.slane %v218_v31, %v335_v30 }
 0x272   :  { %v248_v36 = vadd.f32 %v247_v32, %v237_v25  ;;  %v249_v37 = vadd.f32 %v247_v32, %v242_v28  ;;  %v337_v38 = vadd.f32 %v336_v33, %v327_v27  ;;  %v338_v39 = vadd.f32 %v336_v33, %v331_v35 }
 0x274   :  { %v250_v41 = vmul.f32 0.2, %v248_v36  ;;  %v251_v42 = vmul.f32 0.2, %v249_v37  ;;  %v339_v43 = vmul.f32 0.2, %v337_v38 }
 0x275   :  { %v340_v45 = vmul.f32 0.2, %v338_v39 }
 0x276   :  { %v253_v46 = vmax.f32 %v249_v37, %v251_v42  ;;  %v252_v47 = vmax.f32 %v248_v36, %v250_v41  ;;  %v341_v48 = vmax.f32 %v337_v38, %v339_v43  ;;  %v1020_v37 = vld [vmem:[%s1319_s5] sm:$0xff]  }
 0x277   :  { %v342_v54 = vmax.f32 %v338_v39, %v340_v45  ;;  %v886_v43 = vld [vmem:[%s1318_s4] ss:$0 sm:$0xff] }
 0x278   :  { %v257_v49 = vadd.f32 %v1218_v40, %v253_v46  ;;  %v256_v50 = vadd.f32 %v1220_v44, %v252_v47  ;;  %v343_v53 = vadd.f32 %v1220_v44, %v341_v48 }
 0x279   :  { %v344_v56 = vadd.f32 %v1218_v40, %v342_v54 }
 0x27a   :  { %v261_v51 = vsel %vm157_vm1, %v257_v49, -inf  ;;  %v258_v52 = vsel %vm157_vm1, %v256_v50, -inf  ;;  %v345_v55 = vsel %vm157_vm1, %v343_v53, -inf }
 0x27b   :  { %262 = vmax.xlane.f32.xlu0 %v261_v51  ;;  %259 = vmax.xlane.f32.xlu1 %v258_v52  ;;  %v348_v57 = vsel %vm157_vm1, %v344_v56, -inf }
 0x27f   :  { %346 = vmax.xlane.f32.xlu1 %v345_v55 }
 0x283   :  { %349 = vmax.xlane.f32.xlu1 %v348_v57 }
 0x294   :  { %367 = vrot.lane.b32.xlu1 %v150_v18, %s1091_s1 }
 0x308   :  { %v263_v58 = vpop.xlane.xlu0 %262  ;;  %v260_v59 = vpop.xlane.xlu1 %259 }
 0x309   :  { %v265_v60 = vsub.f32 %v257_v49, %v263_v58  ;;  %v264_v61 = vsub.f32 %v256_v50, %v260_v59 }
 0x30b   :  { %v268_v62 = vmul.f32 1.442695, %v265_v60  ;;  %v266_v63 = vmul.f32 1.442695, %v264_v61 }
 0x30c   :  { %v347_v0 = vpop.xlane.xlu1 %346 }
 0x30d   :  { %1023 = vpow2.f32 %v268_v62  ;;  %v351_v2 = vsub.f32 %v343_v53, %v347_v0 }
 0x30e   :  { %1025 = vpow2.f32 %v266_v63  ;;  %v1021_v63 = vld [vmem:[%s1320_s6] sm:$0xff]  }
 0x30f   :  { %v353_v3 = vmul.f32 1.442695, %v351_v2 }
 0x310   :  { %v350_v4 = vpop.xlane.xlu1 %349 }
 0x311   :  { %1027 = vpow2.f32 %v353_v3  ;;  %v352_v5 = vsub.f32 %v344_v56, %v350_v4 }
 0x313   :  { %v355_v6 = vmul.f32 1.442695, %v352_v5 }
 0x314   :  { %v368_v11 = vpop.permute.xlu1 %367 }
 0x315   :  { %1029 = vpow2.f32 %v355_v6 }
 0x317   :  { %v1024_v7 = vpop.eup %1023 }
 0x318   :  { %v1026_v8 = vpop.eup %1025  ;;  %v273_v19 = vsel %vm157_vm1, %v1024_v7, 0.0 }
 0x319   :  { %v278_v9 = vpack.c.bf16 %v1024_v7, %v1026_v8  ;;  %v270_v18 = vsel %vm157_vm1, %v1026_v8, 0.0 }
 0x31b   :  { %v1028_v10 = vpop.eup %1027  ;;  %959 = vmatmul.mubr.msk.bf16.vlgmr.msra.gmra.mrb[4].mxu1 %vm157_vm1, %v278_v9 }
 0x31c   :  { %963 = vmatpush3.bf16.msra.mxu1 %v368_v11  ;;  %v357_v12 = vsel %vm157_vm1, %v1028_v10, 0.0  ;;  %964 = vmatprep.mubr.msk.bf16.mxu1 %vm1088_vm0, %v1087_v1 }
 0x31d   :  { %358 = vadd.xlane.f32.xlu1 %v357_v12  ;;  %968 = vmatprep.subr.bf16.mxu1 %v1087_v1 }
 0x31f   :  { %v1030_v15 = vpop.eup %1029 }
 0x320   :  { %v360_v16 = vsel %vm157_vm1, %v1030_v15, 0.0  ;;  %v365_v17 = vpack.c.bf16 %v1030_v15, %v1028_v10 }
 0x321   :  { %361 = vadd.xlane.f32.xlu0 %v360_v16 }
 0x323   :  { %965 = vmatmul.mubr.msk.bf16.vlgmr.msra.gmra.mrb[8].mxu1 %vm157_vm1, %v365_v17 }
 0x324   :  { %970 = vmatprep.mubr.msk.bf16.mxu1 %vm1088_vm0, %v1087_v1  ;;  %969 = vmatpush3.bf16.msra.mxu1 %v1020_v37 }
 0x325   :  { %271 = vadd.xlane.f32.xlu0 %v270_v18  ;;  %974 = vmatprep.subr.bf16.mxu1 %v1087_v1 }
 0x329   :  { %274 = vadd.xlane.f32.xlu0 %v273_v19 }
 0x3aa   :  { %v359_v20 = vpop.xlane.xlu1 %358 }
 0x3ab   :  { %1031 = vrcp.f32 %v359_v20 }
 0x3ae   :  { %v362_v21 = vpop.xlane.xlu0 %361 }
 0x3af   :  { %1033 = vrcp.f32 %v362_v21 }
 0x3b2   :  { %v272_v38 = vpop.xlane.xlu0 %271 }
 0x3b3   :  { %1035 = vrcp.f32 %v272_v38 }
 0x3b5   :  { %v1032_v27 = vpop.eup %1031 }
 0x3b6   :  { %v275_v39 = vpop.xlane.xlu0 %274 }
 0x3b7   :  { %1037 = vrcp.f32 %v275_v39 }
 0x3b9   :  { %v1034_v33 = vpop.eup %1033 }
 0x3bd   :  { %v1036_v41 = vpop.eup %1035 }
 0x3c1   :  { %v1038_v45 = vpop.eup %1037 }
 0x3ee   :  { %v316_v22 = vpop.f32.mrb[4].mxu1 }
 0x3ef   :  { %v960_v23 = vpop.f32.mrb[5].mxu1  ;;  %v323_v42 = vmul.f32 %v1036_v41, %v316_v22 }
 0x3f0   :  { %v319_v24 = vpop.f32.mrb[6].mxu1 }
 0x3f1   :  { %v961_v25 = vpop.f32.mrb[7].mxu1  ;;  %v324_v47 = vmul.f32 %v1038_v45, %v319_v24 }
 0x3f6   :  { %v407_v28 = vpop.f32.mrb[8].mxu1 }
 0x3f7   :  { %v414_v31 = vmul.f32 %v1032_v27, %v407_v28  ;;  %v966_v32 = vpop.f32.mrb[9].mxu1 }
 0x3f8   :  { %v410_v34 = vpop.f32.mrb[10].mxu1 }
 0x3f9   :  { %v415_v35 = vmul.f32 %v1034_v33, %v410_v34  ;;  %v967_v36 = vpop.f32.mrb[11].mxu1  ;;  %418 = vrot.lane.b32.xlu0 %v414_v31, %s1092_s14 }
 0x3fb   :  { %420 = vrot.lane.b32.xlu1 %v415_v35, %s1092_s14 }
 0x46b   :  { %v419_v46 = vpop.permute.xlu0 %418 }
 0x46c   :  { %v425_v48 = vsel %vm424_vm2, %v323_v42, %v419_v46 }
 0x46d   :  { %v433_v49 = vadd.f32 %v886_v43, %v425_v48  ;;  %v421_v50 = vpop.permute.xlu1 %420 }
 0x46e   :  { %v426_v51 = vsel %vm424_vm2, %v324_v47, %v421_v50 }
 0x46f   :  { %v437_v52 = vmin.f32 %v433_v49, 0.0  ;;  %v434_v53 = vadd.f32 %v886_v43, %v426_v51  ;;  %vm435_vm3 = vcmp.gt.f32.partialorder %v433_v49, 0.0 }
 0x471   :  { %v439_v54 = vmul.f32 1.442695, %v437_v52  ;;  %v438_v55 = vmin.f32 %v434_v53, 0.0  ;;  %vm436_vm4 = vcmp.gt.f32.partialorder %v434_v53, 0.0 }
 0x473   :  { %1039 = vpow2.f32 %v439_v54  ;;  %v441_v56 = vmul.f32 1.442695, %v438_v55 }
 0x475   :  { %1041 = vpow2.f32 %v441_v56 }
 0x47d   :  { %v1040_v57 = vpop.eup %1039 }
 0x47e   :  { %v887_v58 = vadd.f32 -1.0, %v1040_v57 }
 0x47f   :  { %v1042_v59 = vpop.eup %1041 }
 0x480   :  { %v888_v60 = vadd.f32 -1.0, %v1042_v59  ;;  %v445_v61 = vsel %vm435_vm3, %v433_v49, %v887_v58 }
 0x482   :  { %v446_v62 = vsel %vm436_vm4, %v434_v53, %v888_v60 }
 0x483   :  { %v452_v0 = vpack.c.bf16 %v446_v62, %v445_v61 }
 0x485   :  { %971 = vmatmul.mubr.msk.bf16.vlgmr.msra.gmra.mrb[12].mxu1 %vm157_vm1, %v452_v0 }
 0x486   :  { %975 = vmatpush3.bf16.msra.mxu1 %v1021_v63  ;;  %976 = vmatprep.mubr.msk.bf16.mxu1 %vm1088_vm0, %v1087_v1 }
 0x487   :  { %986 = vmatprep.subr.bf16.mxu1 %v1087_v1 }
 0x558   :  { %v496_v2 = vpop.f32.mrb[12].mxu1 }
 0x559   :  { %v972_v3 = vpop.f32.mrb[13].mxu1 }
 0x55a   :  { %v499_v4 = vpop.f32.mrb[14].mxu1 }
 0x55b   :  { %v503_v5 = vpack.c.bf16 %v499_v4, %v496_v2  ;;  %v973_v6 = vpop.f32.mrb[15].mxu1 }
 0x55d   :  { %977 = vmatmul.mubr.msk.bf16.vlgmr.msra.gmra.mrb[16].mxu1 %vm157_vm1, %v503_v5  ;;  %981 = vmatpush3.bf16.msra.mxu0 %v503_v5 }
 0x55e   :  { %988 = vmatprep.mubr.msk.bf16.mxu1 %vm1088_vm0, %v1087_v1  ;;  %992 = vmatprep.subr.bf16.mxu0 %v1087_v1 }
 0x630   :  { %v547_v7 = vpop.f32.mrb[16].mxu1 }
 0x631   :  { %676 = vperm.xlu0 %1008, %v547_v7   ;;  %v978_v8 = vpop.f32.mrb[17].mxu1 }
 0x632   :  { %v550_v9 = vpop.f32.mrb[18].mxu1 }
 0x633   :  { %680 = vperm.xlu1 %1007, %v550_v9   ;;  %v979_v10 = vpop.f32.mrb[19].mxu1 }
 0x635   :  { %1009 = vset.pattern.permute.xlu0 %v1090_v14 }
 0x636   :  { %588 = vperm.xlu0 %1009, %v547_v7  }
 0x63a   :  { %593 = vperm.xlu0 %1009, %v550_v9  }
 0x63e   :  { %1010 = vset.pattern.permute.xlu0 %v1089_v13 }
 0x65c   :  { %554 = vxpose.xlu1.b32.start [1/2] (short) (narrow) %v547_v7, 8 }
 0x660   :  { %555 = vxpose.xlu1.b32.end [2/2] (short) (narrow) %v550_v9, 8 }
 0x6b0   :  { %v677_v11 = vpop.permute.xlu0 %676 }
 0x6b2   :  { %v681_v12 = vpop.permute.xlu1 %680 }
 0x6b5   :  { %v589_v15 = vpop.permute.xlu0 %588 }
 0x6b9   :  { %v594_v19 = vpop.permute.xlu0 %593 }
 0x6dc   :  { %v570_v16 = vpop.trf.xlu1 }
 0x6dd   :  { %v599_v17 = vrot.slane %v570_v16, %v246_v29  ;;  %v686_v18 = vrot.slane %v570_v16, %v335_v30 }
 0x6df   :  { %v601_v20 = vadd.f32 %v599_v17, %v594_v19  ;;  %v687_v21 = vadd.f32 %v686_v18, %v677_v11  ;;  %v688_v14 = vadd.f32 %v686_v18, %v681_v12  ;;  %v600_v33 = vadd.f32 %v599_v17, %v589_v15  ;;  %v895_v18 = vld [vmem:[%s1321_s7] ss:$0 sm:$0xff] }
 0x6e1   :  { %v603_v22 = vmul.f32 0.2, %v601_v20  ;;  %v689_v23 = vmul.f32 0.2, %v687_v21  ;;  %v690_v24 = vmul.f32 0.2, %v688_v14 }
 0x6e2   :  { %v602_v34 = vmul.f32 0.2, %v600_v33 }
 0x6e3   :  { %v691_v13 = vmax.f32 %v687_v21, %v689_v23  ;;  %v692_v25 = vmax.f32 %v688_v14, %v690_v24  ;;  %v605_v27 = vmax.f32 %v601_v20, %v603_v22 }
 0x6e4   :  { %v604_v35 = vmax.f32 %v600_v33, %v602_v34 }
 0x6e5   :  { %v693_v28 = vadd.f32 %v1220_v44, %v691_v13  ;;  %v694_v31 = vadd.f32 %v1218_v40, %v692_v25  ;;  %v607_v26 = vadd.f32 %v1218_v40, %v605_v27 }
 0x6e6   :  { %v606_v36 = vadd.f32 %v1220_v44, %v604_v35 }
 0x6e7   :  { %v695_v32 = vsel %vm157_vm1, %v693_v28, -inf  ;;  %v698_v29 = vsel %vm157_vm1, %v694_v31, -inf  ;;  %v611_v30 = vsel %vm157_vm1, %v607_v26, -inf }
 0x6e8   :  { %696 = vmax.xlane.f32.xlu0 %v695_v32  ;;  %699 = vmax.xlane.f32.xlu1 %v698_v29  ;;  %v608_v37 = vsel %vm157_vm1, %v606_v36, -inf }
 0x6ec   :  { %612 = vmax.xlane.f32.xlu1 %v611_v30 }
 0x6fe   :  { %717 = vrot.lane.b32.xlu0 %v503_v5, %s1091_s1 }
 0x71d   :  { %609 = vmax.xlane.f32.xlu0 %v608_v37 }
 0x775   :  { %v697_v38 = vpop.xlane.xlu0 %696  ;;  %v700_v39 = vpop.xlane.xlu1 %699 }
 0x776   :  { %v701_v41 = vsub.f32 %v693_v28, %v697_v38  ;;  %v702_v42 = vsub.f32 %v694_v31, %v700_v39 }
 0x778   :  { %v703_v43 = vmul.f32 1.442695, %v701_v41  ;;  %v705_v40 = vmul.f32 1.442695, %v702_v42 }
 0x779   :  { %v718_v45 = vpop.permute.xlu0 %717  ;;  %v613_v46 = vpop.xlane.xlu1 %612 }
 0x77a   :  { %1043 = vpow2.f32 %v703_v43  ;;  %987 = vmatpush3.bf16.msra.mxu1 %v718_v45  ;;  %v615_v47 = vsub.f32 %v607_v26, %v613_v46 }
 0x77b   :  { %1045 = vpow2.f32 %v705_v40 }
 0x77c   :  { %v618_v48 = vmul.f32 1.442695, %v615_v47 }
 0x77e   :  { %1047 = vpow2.f32 %v618_v48 }
 0x784   :  { %v1044_v49 = vpop.eup %1043 }
 0x785   :  { %v1046_v50 = vpop.eup %1045  ;;  %v707_v44 = vsel %vm157_vm1, %v1044_v49, 0.0 }
 0x786   :  { %708 = vadd.xlane.f32.xlu1 %v707_v44  ;;  %v715_v51 = vpack.c.bf16 %v1046_v50, %v1044_v49  ;;  %v710_v53 = vsel %vm157_vm1, %v1046_v50, 0.0 }
 0x788   :  { %989 = vmatmul.mubr.msk.bf16.vlgmr.msra.gmra.mrb[20].mxu1 %vm157_vm1, %v715_v51  ;;  %v1048_v52 = vpop.eup %1047 }
 0x789   :  { %v623_v54 = vsel %vm157_vm1, %v1048_v52, 0.0 }
 0x78a   :  { %711 = vadd.xlane.f32.xlu1 %v710_v53  ;;  %624 = vadd.xlane.f32.xlu0 %v623_v54 }
 0x7aa   :  { %v610_v55 = vpop.xlane.xlu0 %609 }
 0x7ab   :  { %v614_v56 = vsub.f32 %v606_v36, %v610_v55  ;;  %v898_v36 = vld [vmem:[%s1323_s9] ss:$0 sm:$0xff] }
 0x7ad   :  { %v616_v57 = vmul.f32 1.442695, %v614_v56 }
 0x7af   :  { %1049 = vpow2.f32 %v616_v57 }
 0x7b9   :  { %v1050_v58 = vpop.eup %1049 }
 0x7ba   :  { %v620_v59 = vsel %vm157_vm1, %v1050_v58, 0.0  ;;  %v628_v60 = vpack.c.bf16 %v1048_v52, %v1050_v58 }
 0x7bb   :  { %621 = vadd.xlane.f32.xlu1 %v620_v59 }
 0x7bc   :  { %983 = vmatmul.mubr.msk.bf16.vlgmr.msra.gmra.mrb[4].mxu0 %vm157_vm1, %v628_v60 }
 0x7bd   :  { %994 = vmatprep.mubr.msk.bf16.mxu0 %vm1088_vm0, %v1087_v1  ;;  %v1022_v1 = vld [vmem:[%s1322_s8] sm:$0xff]  }
 0x7be   :  { %993 = vmatpush3.bf16.msra.mxu0 %v1022_v1 }
 0x813   :  { %v709_v61 = vpop.xlane.xlu1 %708 }
 0x814   :  { %1051 = vrcp.f32 %v709_v61 }
 0x817   :  { %v712_v62 = vpop.xlane.xlu1 %711  ;;  %v625_v15 = vpop.xlane.xlu0 %624 }
 0x818   :  { %1053 = vrcp.f32 %v712_v62 }
 0x81e   :  { %v1052_v63 = vpop.eup %1051 }
 0x822   :  { %v1054_v4 = vpop.eup %1053 }
 0x848   :  { %v622_v12 = vpop.xlane.xlu1 %621 }
 0x849   :  { %1055 = vrcp.f32 %v622_v12 }
 0x84a   :  { %1057 = vrcp.f32 %v625_v15 }
 0x853   :  { %v1056_v16 = vpop.eup %1055 }
 0x854   :  { %v1058_v19 = vpop.eup %1057 }
 0x85b   :  { %v757_v0 = vpop.f32.mrb[20].mxu1 }
 0x85c   :  { %v764_v2 = vmul.f32 %v1052_v63, %v757_v0  ;;  %v990_v3 = vpop.f32.mrb[21].mxu1 }
 0x85d   :  { %v760_v5 = vpop.f32.mrb[22].mxu1 }
 0x85e   :  { %v765_v6 = vmul.f32 %v1054_v4, %v760_v5  ;;  %768 = vrot.lane.b32.xlu1 %v764_v2, %s1092_s14  ;;  %v991_v7 = vpop.f32.mrb[23].mxu1 }
 0x860   :  { %770 = vrot.lane.b32.xlu0 %v765_v6, %s1092_s14 }
 0x88f   :  { %v666_v8 = vpop.f32.mrb[4].mxu0 }
 0x890   :  { %v984_v9 = vpop.f32.mrb[5].mxu0  ;;  %v673_v17 = vmul.f32 %v1056_v16, %v666_v8 }
 0x891   :  { %v669_v10 = vpop.f32.mrb[6].mxu0 }
 0x892   :  { %v985_v11 = vpop.f32.mrb[7].mxu0  ;;  %v674_v21 = vmul.f32 %v1058_v19, %v669_v10 }
 0x8d0   :  { %v769_v20 = vpop.permute.xlu1 %768 }
 0x8d1   :  { %v774_v14 = vsel %vm424_vm2, %v673_v17, %v769_v20 }
 0x8d2   :  { %v782_v22 = vadd.f32 %v895_v18, %v774_v14  ;;  %v771_v23 = vpop.permute.xlu0 %770 }
 0x8d3   :  { %v775_v24 = vsel %vm424_vm2, %v674_v21, %v771_v23 }
 0x8d4   :  { %v786_v13 = vmin.f32 %v782_v22, 0.0  ;;  %v783_v25 = vadd.f32 %v895_v18, %v775_v24  ;;  %vm784_vm5 = vcmp.gt.f32.partialorder %v782_v22, 0.0 }
 0x8d6   :  { %v788_v27 = vmul.f32 1.442695, %v786_v13  ;;  %v787_v28 = vmin.f32 %v783_v25, 0.0  ;;  %vm785_vm6 = vcmp.gt.f32.partialorder %v783_v25, 0.0 }
 0x8d8   :  { %1059 = vpow2.f32 %v788_v27  ;;  %v790_v31 = vmul.f32 1.442695, %v787_v28 }
 0x8da   :  { %1061 = vpow2.f32 %v790_v31 }
 0x8e2   :  { %v1060_v32 = vpop.eup %1059 }
 0x8e3   :  { %v896_v29 = vadd.f32 -1.0, %v1060_v32 }
 0x8e4   :  { %v1062_v26 = vpop.eup %1061 }
 0x8e5   :  { %v897_v30 = vadd.f32 -1.0, %v1062_v26  ;;  %v794_v33 = vsel %vm784_vm5, %v782_v22, %v896_v29 }
 0x8e7   :  { %v795_v34 = vsel %vm785_vm6, %v783_v25, %v897_v30 }
 0x8e8   :  { %v796_v35 = vpack.c.bf16 %v795_v34, %v794_v33 }
 0x8ea   :  { %995 = vmatmul.mubr.msk.bf16.vlgmr.msra.gmra.mrb[8].mxu0 %vm157_vm1, %v796_v35 }
 0x9bd   :  { %v849_v37 = vpop.f32.mrb[8].mxu0 }
 0x9be   :  { %v850_v38 = vadd.f32 %v898_v36, %v849_v37  ;;  %v996_v39 = vpop.f32.mrb[9].mxu0 }
 0x9bf   :  { %v852_v41 = vpop.f32.mrb[10].mxu0 }
 0x9c0   :  { %856 = vst [vmem:[#allocation2] sm:$0xff] %v850_v38  ;;  %v853_v42 = vadd.f32 %v898_v36, %v852_v41  ;;  %v997_v43 = vpop.f32.mrb[11].mxu0 }
 0x9c2   :  { %857 = vst [vmem:[#allocation2 + $0x8] sm:$0xff] %v853_v42 }
 0x9c3   :  { %1074 = shalt.err (!%p1071_p4)
}
 0x9c4   :  { %s1075_s26 = scalar_lea.hbm %s1324_s10, 256 }
 0x9c5   :  { %p1076_p5 = scmp.ne.s32.totalorder %s1324_s10, %s1075_s26  ;;  %p1079_p6 = scmp.lt.u32.totalorder %s1075_s26, %s1324_s10 }
 0x9c7   :  { %p1081_p7 = pnand %p1079_p6, %p1076_p5 }
 0x9c9   :  { %1084 = shalt.err (!%p1081_p7)
}
 0x9ca   :  { %s1094_s11 = smov 128  }
 0x9cb   :  { %869 = dma.vmem_to_hbm [thread:$0]  %s864_s23, 256, %s1324_s10, [#allocation3], %s1094_s11, %s1094_s11, %s1092_s14  }
 0x9cc   :  { %1085 = dma.done.wait [#allocation3], 256  }
 0x9cd   :  { %1086 = vsyncadd [#allocation3], 4294967040 }
 0x9ce   :  { %873 = vsyncpa [#allocation3], 1 }

</bundles_post_ra>
